<compile_context>
chip_gen: v7x
topology: tpu7x:2x2x1
jax: 0.10.0
libtpu: 0.0.40
codegen_flags: <defaults>
</compile_context>

<pallas_src>
import jax
import jax.numpy as jnp
from jax.experimental import pallas as pl
from jax.experimental.pallas import tpu as pltpu

# SELU constants (match torch.nn.functional.selu)
_SELU_ALPHA = 1.6732632423543772848170429916717
_SELU_SCALE = 1.0507009873554804934193349852946

# Padded (lane-aligned) layer widths.
_D_IN = 28 * 28          # 784
_H1, _H1_PAD = 55, 128
_H2, _H2_PAD = 150, 256
_D_OUT, _D_OUT_PAD = 10, 128
_NEG_BIG = -1e30         # pad bias for the output layer; exp underflows to 0


def _selu(x):
    # f32 elementwise/transcendental math (VPU/EUP), works on all generations.
    return _SELU_SCALE * jnp.where(x > 0, x, _SELU_ALPHA * (jnp.exp(x) - 1.0))


def _mlp_kernel(x_ref, w1_ref, b1_ref, w2_ref, b2_ref, w3_ref, b3_ref, o_ref):
    # One (TB, 784) batch tile per grid step; weights stay resident in VMEM
    # (constant index_maps). x arrives as f32 straight from HBM -> cast to bf16
    # here, in VMEM, so the dominant operand is read exactly once.
    x = x_ref[...].astype(jnp.bfloat16)                  # (TB, 784)

    h1 = jnp.dot(x, w1_ref[...], preferred_element_type=jnp.float32) + b1_ref[...]
    h1 = _selu(h1)                                       # f32, (TB, 128)

    h2 = jnp.dot(h1.astype(jnp.bfloat16), w2_ref[...],
                 preferred_element_type=jnp.float32) + b2_ref[...]
    h2 = _selu(h2)                                       # f32, (TB, 256)

    z = jnp.dot(h2.astype(jnp.bfloat16), w3_ref[...],
                preferred_element_type=jnp.float32) + b3_ref[...]  # (TB, 128)

    # log_softmax along the class axis. Pad columns carry -1e30 via b3, so they
    # never win the max and contribute exp()==0 to the sum. Rows are independent,
    # so any garbage rows of a partial last tile stay contained and get sliced off.
    m = jnp.max(z, axis=-1, keepdims=True)
    s = z - m
    lse = jnp.log(jnp.sum(jnp.exp(s), axis=-1, keepdims=True))
    o_ref[...] = (s - lse).astype(o_ref.dtype)           # lane-dense (TB, 128) store


def _round_up(n, m):
    return ((n + m - 1) // m) * m


def _pad2d(a, rows, cols, fill=0.0):
    return jnp.pad(a, ((0, rows - a.shape[0]), (0, cols - a.shape[1])),
                   constant_values=fill)


def prepare_params(params):
    """One-time weight padding + bf16 cast. Call once, reuse across net_forward calls."""
    w1, b1, w2, b2, w3, b3 = params
    w1p = _pad2d(jnp.asarray(w1, jnp.float32), _D_IN, _H1_PAD).astype(jnp.bfloat16)
    b1p = _pad2d(jnp.asarray(b1, jnp.float32).reshape(1, -1), 1, _H1_PAD)
    w2p = _pad2d(jnp.asarray(w2, jnp.float32), _H1_PAD, _H2_PAD).astype(jnp.bfloat16)
    b2p = _pad2d(jnp.asarray(b2, jnp.float32).reshape(1, -1), 1, _H2_PAD)
    w3p = _pad2d(jnp.asarray(w3, jnp.float32), _H2_PAD, _D_OUT_PAD).astype(jnp.bfloat16)
    b3p = _pad2d(jnp.asarray(b3, jnp.float32).reshape(1, -1), 1, _D_OUT_PAD,
                 fill=_NEG_BIG)
    return (w1p, b1p, w2p, b2p, w3p, b3p)


def _choose_tile(b):
    """Static (trace-time) batch-tile choice."""
    if b <= 8:
        return b                      # block dim == full array dim (always legal)
    target = 1024                     # ~3 MiB f32 x tile; ~12 MiB total working set
    n_tiles = pl.cdiv(b, target)
    if b >= 256:
        n_tiles = max(n_tiles, 2)     # >=2 "parallel" steps -> both v7x TCs busy
    return min(target, _round_up(pl.cdiv(b, n_tiles), 8))


@jax.jit
def net_forward(x, padded_params):
    """x: (B, 1, 28, 28) or (B, 784) float32; padded_params from prepare_params().
    Returns (B, 10) log-probabilities."""
    w1p, b1p, w2p, b2p, w3p, b3p = padded_params
    b = x.shape[0]
    x2d = x.reshape(b, -1).astype(jnp.float32)           # x.view(x.size(0), -1)

    tb = _choose_tile(b)
    grid = (pl.cdiv(b, tb),)
    const2d = lambda i: (0, 0)                           # weights resident across steps

    flops_per_row = 2 * (_D_IN * _H1_PAD + _H1_PAD * _H2_PAD + _H2_PAD * _D_OUT_PAD)
    weight_bytes = ((w1p.size + w2p.size + w3p.size) * 2
                    + (b1p.size + b2p.size + b3p.size) * 4)
    cost = pl.CostEstimate(
        flops=b * flops_per_row,
        transcendentals=b * (_H1_PAD + _H2_PAD + _D_OUT_PAD + 1),
        bytes_accessed=b * (_D_IN * 4 + _D_OUT_PAD * 4) + weight_bytes,
    )

    out = pl.pallas_call(
        _mlp_kernel,
        out_shape=jax.ShapeDtypeStruct((b, _D_OUT_PAD), jnp.float32),
        grid=grid,
        in_specs=[
            pl.BlockSpec((tb, _D_IN), lambda i: (i, 0)),        # x: tiled over batch
            pl.BlockSpec((_D_IN, _H1_PAD), const2d),
            pl.BlockSpec((1, _H1_PAD), const2d),
            pl.BlockSpec((_H1_PAD, _H2_PAD), const2d),
            pl.BlockSpec((1, _H2_PAD), const2d),
            pl.BlockSpec((_H2_PAD, _D_OUT_PAD), const2d),
            pl.BlockSpec((1, _D_OUT_PAD), const2d),
        ],
        out_specs=pl.BlockSpec((tb, _D_OUT_PAD), lambda i: (i, 0)),
        compiler_params=pltpu.CompilerParams(
            dimension_semantics=("parallel",),
            vmem_limit_bytes=32 * 1024 * 1024,
        ),
        cost_estimate=cost,
    )(x2d, w1p, b1p, w2p, b2p, w3p, b3p)

    return out[:, :_D_OUT]


def init_params(key):
    """Deterministic init mirroring nn.Linear's U(-1/sqrt(fan_in), 1/sqrt(fan_in))."""
    def linear(key, fan_in, fan_out):
        kw, kb = jax.random.split(key)
        bound = 1.0 / jnp.sqrt(float(fan_in))
        w = jax.random.uniform(kw, (fan_in, fan_out), jnp.float32, -bound, bound)
        b = jax.random.uniform(kb, (1, fan_out), jnp.float32, -bound, bound)
        return w, b

    k1, k2, k3 = jax.random.split(key, 3)
    w1, b1 = linear(k1, _D_IN, _H1)
    w2, b2 = linear(k2, _H1, _H2)
    w3, b3 = linear(k3, _H2, _D_OUT)
    return (w1, b1, w2, b2, w3, b3)


def _reference_forward(x, params):
    """Pure-JAX reference emulating the kernel's bf16-operand / f32-accumulate dots."""
    w1, b1, w2, b2, w3, b3 = params
    xb = x.reshape(x.shape[0], -1).astype(jnp.bfloat16)
    h1 = _selu(jnp.dot(xb, w1.astype(jnp.bfloat16),
                       preferred_element_type=jnp.float32) + b1)
    h2 = _selu(jnp.dot(h1.astype(jnp.bfloat16), w2.astype(jnp.bfloat16),
                       preferred_element_type=jnp.float32) + b2)
    z = jnp.dot(h2.astype(jnp.bfloat16), w3.astype(jnp.bfloat16),
                preferred_element_type=jnp.float32) + b3
    return jax.nn.log_softmax(z, axis=1)


if __name__ == "__main__":
    key = jax.random.PRNGKey(0)
    kx, kp = jax.random.split(key)

    # Small batch of MNIST-shaped inputs, NCHW like PyTorch.
    x = jax.random.normal(kx, (2, 1, 28, 28), dtype=jnp.float32)
    params = init_params(kp)
    padded_params = prepare_params(params)     # one-time weight prep

    out = net_forward(x, padded_params)
    out = jax.block_until_ready(out)

    ref = _reference_forward(x, params)
    assert out.shape == (2, 10)
    assert jnp.allclose(out, ref, atol=1e-3, rtol=1e-3), "mismatch vs JAX reference"

    print("KERNEL_OK")
</pallas_src>

<mosaic_0001>
module attributes {stable_mosaic.version = 11 : i64} {
  func.func @_mlp_kernel(%arg0: i32, %arg1: memref<2x784xf32, #tpu.memory_space<vmem>>, %arg2: memref<784x128xbf16, #tpu.memory_space<vmem>>, %arg3: memref<1x128xf32, #tpu.memory_space<vmem>>, %arg4: memref<128x256xbf16, #tpu.memory_space<vmem>>, %arg5: memref<1x256xf32, #tpu.memory_space<vmem>>, %arg6: memref<256x128xbf16, #tpu.memory_space<vmem>>, %arg7: memref<1x128xf32, #tpu.memory_space<vmem>>, %arg8: memref<2x128xf32, #tpu.memory_space<vmem>>) attributes {dimension_semantics = [#tpu.dimension_semantics<parallel>], iteration_bounds = array<i64: 1>, scalar_prefetch = 0 : i64, scratch_operands = 0 : i64, tpu.core_type = #tpu.core_type<tc>, window_params = [{transform_indices = @transform_0, window_bounds = array<i64: 2, 784>}, {pipeline_mode = #tpu.pipeline_mode<synchronous>, transform_indices = @transform_1, window_bounds = array<i64: 784, 128>}, {pipeline_mode = #tpu.pipeline_mode<synchronous>, transform_indices = @transform_2, window_bounds = array<i64: 1, 128>}, {pipeline_mode = #tpu.pipeline_mode<synchronous>, transform_indices = @transform_3, window_bounds = array<i64: 128, 256>}, {pipeline_mode = #tpu.pipeline_mode<synchronous>, transform_indices = @transform_4, window_bounds = array<i64: 1, 256>}, {pipeline_mode = #tpu.pipeline_mode<synchronous>, transform_indices = @transform_5, window_bounds = array<i64: 256, 128>}, {pipeline_mode = #tpu.pipeline_mode<synchronous>, transform_indices = @transform_6, window_bounds = array<i64: 1, 128>}, {transform_indices = @transform_7, window_bounds = array<i64: 2, 128>}]} {
    %c0 = arith.constant 0 : index
    %c0_0 = arith.constant 0 : index
    %0 = vector.load %arg1[%c0, %c0_0] : memref<2x784xf32, #tpu.memory_space<vmem>>, vector<2x784xf32>
    %1 = arith.truncf %0 : vector<2x784xf32> to vector<2x784xbf16>
    %c0_1 = arith.constant 0 : index
    %c0_2 = arith.constant 0 : index
    %2 = vector.load %arg2[%c0_1, %c0_2] : memref<784x128xbf16, #tpu.memory_space<vmem>>, vector<784x128xbf16>
    %cst = arith.constant dense<0.000000e+00> : vector<2x128xf32>
    %3 = tpu.matmul %1, %2, %cst {dimension_numbers = #tpu.dot_dimension_numbers<[1], [0], [0], [1], [0, 0, 1, 1], [], []>} : vector<2x784xbf16>, vector<784x128xbf16>, vector<2x128xf32> -> vector<2x128xf32>
    %c0_3 = arith.constant 0 : index
    %c0_4 = arith.constant 0 : index
    %4 = vector.load %arg3[%c0_3, %c0_4] : memref<1x128xf32, #tpu.memory_space<vmem>>, vector<1x128xf32>
    %5 = vector.broadcast %4 : vector<1x128xf32> to vector<2x128xf32>
    %6 = arith.addf %3, %5 : vector<2x128xf32>
    %cst_5 = arith.constant 0.000000e+00 : f32
    %7 = vector.broadcast %cst_5 : f32 to vector<2x128xf32>
    %8 = arith.cmpf ogt, %6, %7 : vector<2x128xf32>
    %9 = math.exp %6 : vector<2x128xf32>
    %cst_6 = arith.constant 1.000000e+00 : f32
    %10 = vector.broadcast %cst_6 : f32 to vector<2x128xf32>
    %11 = arith.subf %9, %10 : vector<2x128xf32>
    %cst_7 = arith.constant 1.67326319 : f32
    %12 = vector.broadcast %cst_7 : f32 to vector<2x128xf32>
    %13 = arith.mulf %12, %11 : vector<2x128xf32>
    %14 = arith.select %8, %6, %13 : vector<2x128xi1>, vector<2x128xf32>
    %cst_8 = arith.constant 1.05070102 : f32
    %15 = vector.broadcast %cst_8 : f32 to vector<2x128xf32>
    %16 = arith.mulf %15, %14 : vector<2x128xf32>
    %17 = arith.truncf %16 : vector<2x128xf32> to vector<2x128xbf16>
    %c0_9 = arith.constant 0 : index
    %c0_10 = arith.constant 0 : index
    %18 = vector.load %arg4[%c0_9, %c0_10] : memref<128x256xbf16, #tpu.memory_space<vmem>>, vector<128x256xbf16>
    %cst_11 = arith.constant dense<0.000000e+00> : vector<2x256xf32>
    %19 = tpu.matmul %17, %18, %cst_11 {dimension_numbers = #tpu.dot_dimension_numbers<[1], [0], [0], [1], [0, 0, 1, 1], [], []>} : vector<2x128xbf16>, vector<128x256xbf16>, vector<2x256xf32> -> vector<2x256xf32>
    %c0_12 = arith.constant 0 : index
    %c0_13 = arith.constant 0 : index
    %20 = vector.load %arg5[%c0_12, %c0_13] : memref<1x256xf32, #tpu.memory_space<vmem>>, vector<1x256xf32>
    %21 = vector.broadcast %20 : vector<1x256xf32> to vector<2x256xf32>
    %22 = arith.addf %19, %21 : vector<2x256xf32>
    %cst_14 = arith.constant 0.000000e+00 : f32
    %23 = vector.broadcast %cst_14 : f32 to vector<2x256xf32>
    %24 = arith.cmpf ogt, %22, %23 : vector<2x256xf32>
    %25 = math.exp %22 : vector<2x256xf32>
    %cst_15 = arith.constant 1.000000e+00 : f32
    %26 = vector.broadcast %cst_15 : f32 to vector<2x256xf32>
    %27 = arith.subf %25, %26 : vector<2x256xf32>
    %cst_16 = arith.constant 1.67326319 : f32
    %28 = vector.broadcast %cst_16 : f32 to vector<2x256xf32>
    %29 = arith.mulf %28, %27 : vector<2x256xf32>
    %30 = arith.select %24, %22, %29 : vector<2x256xi1>, vector<2x256xf32>
    %cst_17 = arith.constant 1.05070102 : f32
    %31 = vector.broadcast %cst_17 : f32 to vector<2x256xf32>
    %32 = arith.mulf %31, %30 : vector<2x256xf32>
    %33 = arith.truncf %32 : vector<2x256xf32> to vector<2x256xbf16>
    %c0_18 = arith.constant 0 : index
    %c0_19 = arith.constant 0 : index
    %34 = vector.load %arg6[%c0_18, %c0_19] : memref<256x128xbf16, #tpu.memory_space<vmem>>, vector<256x128xbf16>
    %cst_20 = arith.constant dense<0.000000e+00> : vector<2x128xf32>
    %35 = tpu.matmul %33, %34, %cst_20 {dimension_numbers = #tpu.dot_dimension_numbers<[1], [0], [0], [1], [0, 0, 1, 1], [], []>} : vector<2x256xbf16>, vector<256x128xbf16>, vector<2x128xf32> -> vector<2x128xf32>
    %c0_21 = arith.constant 0 : index
    %c0_22 = arith.constant 0 : index
    %36 = vector.load %arg7[%c0_21, %c0_22] : memref<1x128xf32, #tpu.memory_space<vmem>>, vector<1x128xf32>
    %37 = vector.broadcast %36 : vector<1x128xf32> to vector<2x128xf32>
    %38 = arith.addf %35, %37 : vector<2x128xf32>
    %cst_23 = arith.constant dense<0xFF800000> : vector<2xf32>
    %39 = vector.multi_reduction <maximumf>, %38, %cst_23 [1] : vector<2x128xf32> to vector<2xf32>
    %40 = vector.shape_cast %39 : vector<2xf32> to vector<2x1xf32>
    %41 = vector.broadcast %40 : vector<2x1xf32> to vector<2x128xf32>
    %42 = arith.subf %38, %41 : vector<2x128xf32>
    %43 = math.exp %42 : vector<2x128xf32>
    %cst_24 = arith.constant dense<0.000000e+00> : vector<2xf32>
    %44 = vector.multi_reduction <add>, %43, %cst_24 [1] : vector<2x128xf32> to vector<2xf32>
    %45 = vector.shape_cast %44 : vector<2xf32> to vector<2x1xf32>
    %46 = math.log %45 : vector<2x1xf32>
    %47 = vector.broadcast %46 : vector<2x1xf32> to vector<2x128xf32>
    %48 = arith.subf %42, %47 : vector<2x128xf32>
    %c0_25 = arith.constant 0 : index
    %c0_26 = arith.constant 0 : index
    %49 = vector.load %arg8[%c0_25, %c0_26] : memref<2x128xf32, #tpu.memory_space<vmem>>, vector<2x128xf32>
    tpu.vector_store %arg8[%c0_25, %c0_26], %48 {strides = array<i32>} : memref<2x128xf32, #tpu.memory_space<vmem>>, vector<2x128xf32>,
    return
  }
  func.func @transform_0(%arg0: i32) -> (i32, i32) {
    %c0_i32 = arith.constant 0 : i32
    %c0_i32_0 = arith.constant 0 : i32
    return %arg0, %c0_i32 : i32, i32
  }
  func.func @transform_1(%arg0: i32) -> (i32, i32) {
    %c0_i32 = arith.constant 0 : i32
    %c0_i32_0 = arith.constant 0 : i32
    %c0_i32_1 = arith.constant 0 : i32
    return %c0_i32, %c0_i32_0 : i32, i32
  }
  func.func @transform_2(%arg0: i32) -> (i32, i32) {
    %c0_i32 = arith.constant 0 : i32
    %c0_i32_0 = arith.constant 0 : i32
    %c0_i32_1 = arith.constant 0 : i32
    return %c0_i32, %c0_i32_0 : i32, i32
  }
  func.func @transform_3(%arg0: i32) -> (i32, i32) {
    %c0_i32 = arith.constant 0 : i32
    %c0_i32_0 = arith.constant 0 : i32
    %c0_i32_1 = arith.constant 0 : i32
    return %c0_i32, %c0_i32_0 : i32, i32
  }
  func.func @transform_4(%arg0: i32) -> (i32, i32) {
    %c0_i32 = arith.constant 0 : i32
    %c0_i32_0 = arith.constant 0 : i32
    %c0_i32_1 = arith.constant 0 : i32
    return %c0_i32, %c0_i32_0 : i32, i32
  }
  func.func @transform_5(%arg0: i32) -> (i32, i32) {
    %c0_i32 = arith.constant 0 : i32
    %c0_i32_0 = arith.constant 0 : i32
    %c0_i32_1 = arith.constant 0 : i32
    return %c0_i32, %c0_i32_0 : i32, i32
  }
  func.func @transform_6(%arg0: i32) -> (i32, i32) {
    %c0_i32 = arith.constant 0 : i32
    %c0_i32_0 = arith.constant 0 : i32
    %c0_i32_1 = arith.constant 0 : i32
    return %c0_i32, %c0_i32_0 : i32, i32
  }
  func.func @transform_7(%arg0: i32) -> (i32, i32) {
    %c0_i32 = arith.constant 0 : i32
    %c0_i32_0 = arith.constant 0 : i32
    return %arg0, %c0_i32 : i32, i32
  }
}

</mosaic_0001>

<bundles_post_ra>
// kernel: net_forward.1
= control target key start
LH: loop header
LB: loop body
LE: loop exit
PB: predicated region body
PF: predicated region fallthrough
CT: control target
= control target key end

     0   :  { %12 = vsyncpa [#allocation3], 0  ;;  %s1566_s0 = inlined_call_operand.vmem [shape: f32[2,784], index: 0, kind: input, shape index: {}]   ;;  %s1567_s1 = inlined_call_operand.hbm [shape: bf16[784,128], index: 1, kind: input, shape index: {}]   ;;  %s1568_s2 = inlined_call_operand.vmem [shape: f32[1,128], index: 2, kind: input, shape index: {}]   ;;  %s1569_s3 = inlined_call_operand.vmem [shape: bf16[128,256], index: 3, kind: input, shape index: {}]   ;;  %s1570_s4 = inlined_call_operand.vmem [shape: f32[1,256], index: 4, kind: input, shape index: {}]   ;;  %s1571_s5 = inlined_call_operand.hbm [shape: bf16[256,128], index: 5, kind: input, shape index: {}]   ;;  %s1572_s6 = inlined_call_operand.vmem [shape: f32[1,128], index: 6, kind: input, shape index: {}]   ;;  %s1573_s7 = inlined_call_operand.hbm [shape: f32[2,128], index: 7, kind: output, shape index: {}]  }
   0x1   :  { %13 = vsyncpa [#allocation6], 0 }
   0x2   :  { %14 = vsyncpa [#allocation4], 0  ;;  %s1413_s24 = smov [#allocation2]   ;;  %s1341_s28 = scalar_lea.hbm %s1567_s1, 6272 }
   0x3   :  { %s22_s25 = sshll.u32 %s1413_s24, 4  ;;  %p1342_p0 = scmp.ne.s32.totalorder %s1567_s1, %s1341_s28  ;;  %s23_s25 = int_to_ptr.vmem [resolvable:$true] %s22_s25 }
   0x4   :  { %p1345_p1 = scmp.lt.u32.totalorder %s1341_s28, %s1567_s1 }
   0x6   :  { %p1347_p2 = pnand %p1345_p1, %p1342_p0 }
   0x8   :  { %1350 = shalt.err (!%p1347_p2)
}
   0x9   :  { %s1351_s10 = scalar_lea.vmem %s23_s25, 6272  ;;  %p1356_p4 = scmp.lt.s32.totalorder %s23_s25, %s23_s25 }
   0xa   :  { %p1352_p3 = scmp.ne.s32.totalorder %s23_s25, %s1351_s10  ;;  %p1357_p5 = scmp.lt.s32.totalorder %s1351_s10, %s1351_s10 }
   0xc   :  { %p1358_p6 = por %p1357_p5, %p1356_p4 }
   0xe   :  { %p1359_p7 = pnand %p1358_p6, %p1352_p3 }
  0x10   :  { %1362 = shalt.err (!%p1359_p7)
}
  0x11   :  { %s1414_s11 = smov 64   ;;  %s1415_s12 = smov 4  }
  0x12   :  { %28 = dma.hbm_to_vmem [thread:$0]  %s1567_s1, 6272, %s23_s25, [#allocation3], %s1414_s11, %s1414_s11, %s1415_s12  }
  0x13   :  { %s1416_s15 = smov [#allocation5]   ;;  %s1363_s19 = scalar_lea.hbm %s1571_s5, 2048 }
  0x14   :  { %s40_s16 = sshll.u32 %s1416_s15, 4  ;;  %p1364_p8 = scmp.ne.s32.totalorder %s1571_s5, %s1363_s19  ;;  %s41_s16 = int_to_ptr.vmem [resolvable:$true] %s40_s16 }
  0x15   :  { %p1367_p9 = scmp.lt.u32.totalorder %s1363_s19, %s1571_s5 }
  0x17   :  { %p1369_p10 = pnand %p1367_p9, %p1364_p8 }
  0x19   :  { %1372 = shalt.err (!%p1369_p10)
}
  0x1a   :  { %s1373_s24 = scalar_lea.vmem %s41_s16, 2048  ;;  %p1378_p12 = scmp.lt.s32.totalorder %s41_s16, %s41_s16 }
  0x1b   :  { %p1374_p11 = scmp.ne.s32.totalorder %s41_s16, %s1373_s24  ;;  %p1379_p13 = scmp.lt.s32.totalorder %s1373_s24, %s1373_s24 }
  0x1d   :  { %p1380_p0 = por %p1379_p13, %p1378_p12 }
  0x1f   :  { %p1381_p1 = pnand %p1380_p0, %p1374_p11 }
  0x21   :  { %1384 = shalt.err (!%p1381_p1)
}
  0x22   :  { %46 = dma.hbm_to_vmem [thread:$0]  %s1571_s5, 2048, %s41_s16, [#allocation6], %s1414_s11, %s1414_s11, %s1415_s12  }
  0x23   :  { %1407 = dma.done.wait [#allocation3], 6272  }
  0x24   :  { %1408 = vsyncadd [#allocation3], 4294961024 }
  0x25   :  { %1409 = dma.done.wait [#allocation6], 2048  }
  0x26   :  { %1410 = vsyncadd [#allocation6], 4294965248  ;;  %v1240_v0 = vld [vmem:[#allocation2 + $0x40] sm:$0xff]   ;;  %v1244_v4 = vld [vmem:[#allocation2 + $0x48] sm:$0xff]   ;;  %v1417_v21 = vmov 1983009808   ;;  %v64_v23 = vlaneseq }
  0x27   :  { %v1241_v1 = vld [vmem:[#allocation2] sm:$0xff]   ;;  %1135 = vmatprep.subr.bf16.mxu0 %v1240_v0  ;;  %v1245_v5 = vld [vmem:[#allocation2 + $0x8] sm:$0xff]   ;;  %v1248_v8 = vld [vmem:[#allocation2 + $0x50] sm:$0xff]   ;;  %v62_v22 = vunpack.c.l.s4 %v1417_v21  ;;  %v1418_v45 = vmov 0.0   ;;  %vm1419_vm0 = vmmov 0   ;;  %vm506_vm1 = vcmask 130048  }
  0x28   :  { %v1242_v2 = vld [vmem:[#allocation2 + $0xc0] sm:$0xff]   ;;  %1136 = vmatpush3.bf16.msra.mxu0 %v1241_v1  ;;  %v1246_v6 = vld [vmem:[#allocation2 + $0xc8] sm:$0xff]   ;;  %v1249_v9 = vld [vmem:[#allocation2 + $0x10] sm:$0xff]   ;;  %v1486_v29 = vshrl.u32 %v64_v23, 7  ;;  %vm1018_vm5 = vcmask 1041408   ;;  %s1421_s14 = smov [#allocation7]  }
  0x29   :  { %v1243_v3 = vld [vmem:[#allocation2 + $0x80] sm:$0xff]   ;;  %1157 = vmatprep.subr.bf16.mxu1 %v1242_v2  ;;  %1137 = vmatprep.subr.bf16.mxu0 %v1244_v4  ;;  %v1247_v7 = vld [vmem:[#allocation2 + $0x88] sm:$0xff]   ;;  %v1250_v10 = vld [vmem:[#allocation2 + $0xd0] sm:$0xff]   ;;  %v63_v28 = vunpack.c.0.s8 %v62_v22  ;;  %s1038_s15 = sshll.u32 %s1421_s14, 4  ;;  %s1039_s15 = int_to_ptr.vmem [resolvable:$true] %s1038_s15 }
  0x2a   :  { %1158 = vmatpush3.bf16.msra.mxu1 %v1243_v3  ;;  %v1251_v11 = vld [vmem:[#allocation2 + $0x90] sm:$0xff]   ;;  %v1252_v12 = vld [vmem:[#allocation2 + $0x58] sm:$0xff]   ;;  %v1256_v16 = vld [vmem:[#allocation2 + $0x60] sm:$0xff]   ;;  %p1390_p3 = scmp.lt.s32.totalorder %s1039_s15, %s1039_s15 }
  0x2b   :  { %1159 = vmatprep.subr.bf16.mxu1 %v1246_v6  ;;  %v1253_v13 = vld [vmem:[#allocation2 + $0x18] sm:$0xff]   ;;  %v1257_v17 = vld [vmem:[#allocation2 + $0x20] sm:$0xff]   ;;  %v1260_v20 = vld [vmem:[#allocation2 + $0x68] sm:$0xff]   ;;  %v66_v34 = vsub.s32 %v63_v28, %v1486_v29 }
  0x2c   :  { %1138 = vmatpush3.bf16.msra.mxu0 %v1245_v5  ;;  %v1254_v14 = vld [vmem:[#allocation2 + $0xd8] sm:$0xff]   ;;  %v1258_v18 = vld [vmem:[#allocation2 + $0xe0] sm:$0xff]   ;;  %v1261_v24 = vld [vmem:[#allocation2 + $0x28] sm:$0xff]  }
  0x2d   :  { %1139 = vmatprep.subr.bf16.mxu0 %v1248_v8  ;;  %v1255_v15 = vld [vmem:[#allocation2 + $0x98] sm:$0xff]   ;;  %v1259_v19 = vld [vmem:[#allocation2 + $0xa0] sm:$0xff]   ;;  %v1262_v25 = vld [vmem:[#allocation2 + $0xe8] sm:$0xff]  }
  0x2e   :  { %1160 = vmatpush3.bf16.msra.mxu1 %v1247_v7  ;;  %v1263_v26 = vld [vmem:[#allocation2 + $0xa8] sm:$0xff]   ;;  %v1264_v27 = vld [vmem:[#allocation2 + $0x70] sm:$0xff]   ;;  %v1268_v33 = vld [vmem:[#allocation2 + $0x78] sm:$0xff]  }
  0x2f   :  { %1161 = vmatprep.subr.bf16.mxu1 %v1250_v10  ;;  %v1265_v30 = vld [vmem:[#allocation2 + $0x30] sm:$0xff]   ;;  %v1269_v35 = vld [vmem:[#allocation2 + $0x38] sm:$0xff]   ;;  %v56_v37 = vld [vmem:[%s1566_s0] sm:$0xff] }
  0x30   :  { %1140 = vmatpush3.bf16.msra.mxu0 %v1249_v9  ;;  %v1266_v31 = vld [vmem:[#allocation2 + $0xf0] sm:$0xff]   ;;  %v1270_v36 = vld [vmem:[#allocation2 + $0xf8] sm:$0xff]   ;;  %v67_v38 = vrot.slane %v56_v37, %v66_v34  ;;  %v60_v40 = vcombine.high %v56_v37, %v56_v37  ;;  %v1272_v41 = vld [vmem:[#allocation2 + $0x140] sm:$0xff]  }
  0x31   :  { %1141 = vmatprep.subr.bf16.mxu0 %v1252_v12  ;;  %v1267_v32 = vld [vmem:[#allocation2 + $0xb0] sm:$0xff]   ;;  %v1271_v39 = vld [vmem:[#allocation2 + $0xb8] sm:$0xff]   ;;  %v1274_v48 = vld [vmem:[#allocation2 + $0x100] sm:$0xff]  }
  0x32   :  { %1162 = vmatpush3.bf16.msra.mxu1 %v1251_v11  ;;  %v75_v42 = vcombine.high %v67_v38, %v67_v38  ;;  %v74_v43 = vrot.slane %v60_v40, %v66_v34  ;;  %v100_v44 = vpack.c.bf16 %v67_v38, %v67_v38  ;;  %v1275_v50 = vld [vmem:[#allocation2 + $0x148] sm:$0xff]   ;;  %v1277_v53 = vld [vmem:[#allocation2 + $0x150] sm:$0xff]   ;;  %v1279_v55 = vld [vmem:[#allocation2 + $0x158] sm:$0xff]  }
  0x33   :  { %1163 = vmatprep.subr.bf16.mxu1 %v1254_v14  ;;  %v1276_v52 = vld [vmem:[#allocation2 + $0x108] sm:$0xff]   ;;  %v1278_v54 = vld [vmem:[#allocation2 + $0x110] sm:$0xff]   ;;  %v1280_v56 = vld [vmem:[#allocation2 + $0x118] sm:$0xff]  }
  0x34   :  { %1142 = vmatpush3.bf16.msra.mxu0 %v1253_v13  ;;  %v101_v46 = vpack.c.bf16 %v75_v42, %v75_v42  ;;  %v76_v47 = vcombine.high %v74_v43, %v74_v43  ;;  %v102_v49 = vpack.c.bf16 %v74_v43, %v74_v43  ;;  %v1281_v57 = vld [vmem:[#allocation2 + $0x160] sm:$0xff]   ;;  %v57_v59 = vld [vmem:[%s1566_s0 + $0x8] sm:$0x3f]  ;;  %v1285_v5 = vld [vmem:[#allocation2 + $0x170] sm:$0xff]  }
  0x35   :  { %1143 = vmatprep.subr.bf16.mxu0 %v1256_v16  ;;  %v1289_v58 = vld [vmem:[#allocation2 + $0x180] sm:$0xff]   ;;  %v77_v61 = vcombine.high %v57_v59, %v57_v59  ;;  %v84_v62 = vrot.slane %v57_v59, %v66_v34  ;;  %v1283_v63 = vld [vmem:[#allocation2 + $0x168] sm:$0xff]   ;;  %v1286_v6 = vld [vmem:[#allocation2 + $0x130] sm:$0xff]  }
  0x36   :  { %1164 = vmatpush3.bf16.msra.mxu1 %v1255_v15  ;;  %542 = vmatprep.mubr.bf16.mxu0 %v101_v46  ;;  %v103_v51 = vpack.c.bf16 %v76_v47, %v76_v47  ;;  %v1282_v60 = vld [vmem:[#allocation2 + $0x120] sm:$0xff]   ;;  %v1284_v2 = vld [vmem:[#allocation2 + $0x128] sm:$0xff]   ;;  %v1287_v7 = vld [vmem:[#allocation2 + $0x178] sm:$0xff]  }
  0x37   :  { %1165 = vmatprep.subr.bf16.mxu1 %v1258_v18  ;;  %v91_v0 = vrot.slane %v77_v61, %v66_v34  ;;  %v92_v1 = vcombine.high %v84_v62, %v84_v62  ;;  %v1288_v8 = vld [vmem:[#allocation2 + $0x138] sm:$0xff]   ;;  %v104_v9 = vpack.c.bf16 %v84_v62, %v84_v62  ;;  %v1291_v10 = vld [vmem:[%s1569_s3] ss:$8 sps:$4 sm:$0xff]   ;;  %v1293_v11 = vld [vmem:[%s1569_s3 + $0x4] ss:$8 sps:$4 sm:$0xff]  }
  0x38   :  { %1144 = vmatpush3.bf16.msra.mxu0 %v1257_v17  ;;  %582 = vmatprep.mubr.bf16.mxu1 %v103_v51  ;;  %v1296_v12 = vld [vmem:[%s1569_s3 + $0x14] ss:$8 sps:$4 sm:$0xff]   ;;  %v1294_v13 = vld [vmem:[%s1569_s3 + $0x10] ss:$8 sps:$4 sm:$0xff]   ;;  %v1299_v14 = vld [vmem:[%s1569_s3 + $0x24] ss:$8 sps:$4 sm:$0xff]  }
  0x39   :  { %1145 = vmatprep.subr.bf16.mxu0 %v1260_v20  ;;  %v105_v3 = vpack.c.bf16 %v92_v1, %v92_v1  ;;  %v106_v4 = vpack.c.bf16 %v91_v0, %v91_v0  ;;  %v1297_v15 = vld [vmem:[%s1569_s3 + $0x20] ss:$8 sps:$4 sm:$0xff]   ;;  %v1302_v16 = vld [vmem:[%s1569_s3 + $0x34] ss:$8 sps:$4 sm:$0xff]   ;;  %v1300_v17 = vld [vmem:[%s1569_s3 + $0x30] ss:$8 sps:$4 sm:$0xff]  }
  0x3a   :  { %1166 = vmatpush3.bf16.msra.mxu1 %v1259_v19  ;;  %v1305_v18 = vld [vmem:[%s1569_s3 + $0x44] ss:$8 sps:$4 sm:$0xff]   ;;  %v1303_v19 = vld [vmem:[%s1569_s3 + $0x40] ss:$8 sps:$4 sm:$0xff]   ;;  %v1308_v20 = vld [vmem:[%s1569_s3 + $0x54] ss:$8 sps:$4 sm:$0xff]  }
  0x3b   :  { %1167 = vmatprep.subr.bf16.mxu1 %v1262_v25  ;;  %v1306_v21 = vld [vmem:[%s1569_s3 + $0x50] ss:$8 sps:$4 sm:$0xff]   ;;  %v1311_v22 = vld [vmem:[%s1569_s3 + $0x64] ss:$8 sps:$4 sm:$0xff]   ;;  %v1309_v23 = vld [vmem:[%s1569_s3 + $0x60] ss:$8 sps:$4 sm:$0xff]  }
  0x3c   :  { %1146 = vmatpush3.bf16.msra.mxu0 %v1261_v24  ;;  %v1314_v24 = vld [vmem:[%s1569_s3 + $0x74] ss:$8 sps:$4 sm:$0xff]   ;;  %v1312_v25 = vld [vmem:[%s1569_s3 + $0x70] ss:$8 sps:$4 sm:$0xff]   ;;  %v1316_v28 = vld [vmem:[#allocation5] sm:$0xff]  }
  0x3d   :  { %1147 = vmatprep.subr.bf16.mxu0 %v1264_v27  ;;  %v1315_v27 = vld [vmem:[#allocation5 + $0x40] sm:$0xff]   ;;  %v1318_v62 = vld [vmem:[#allocation5 + $0x8] sm:$0xff]   ;;  %v1320_v0 = vld [vmem:[#allocation5 + $0x10] sm:$0xff]  }
  0x3e   :  { %1168 = vmatpush3.bf16.msra.mxu1 %v1263_v26  ;;  %v1420_v26 = vmov 0   ;;  %v1321_v1 = vld [vmem:[#allocation5 + $0x58] sm:$0xff]  }
  0x3f   :  { %1169 = vmatprep.subr.bf16.mxu1 %v1266_v31 }
  0x40   :  { %1148 = vmatpush3.bf16.msra.mxu0 %v1265_v30  ;;  %v1317_v30 = vld [vmem:[#allocation5 + $0x48] sm:$0xff]  }
  0x41   :  { %1149 = vmatprep.subr.bf16.mxu0 %v1268_v33 }
  0x42   :  { %1170 = vmatpush3.bf16.msra.mxu1 %v1267_v32  ;;  %v1048_v32 = vld [vmem:[%s1568_s2] ss:$0 sm:$0xff] }
  0x43   :  { %1171 = vmatprep.subr.bf16.mxu1 %v1270_v36 }
  0x44   :  { %1150 = vmatpush3.bf16.msra.mxu0 %v1269_v35 }
  0x45   :  { %1179 = vmatprep.subr.bf16.mxu0 %v1272_v41 }
  0x46   :  { %1172 = vmatpush3.bf16.msra.mxu1 %v1271_v39 }
  0x47   :  { %1225 = vmatprep.subr.bf16.mxu1 %v1418_v45  ;;  %543 = vmatmul.mubr.bf16.vlgmr.msra.gmra.mrb[0].mxu0 %v100_v44 }
  0x48   :  { %1180 = vmatpush3.bf16.msra.mxu0 %v1274_v48  ;;  %622 = vmatprep.mubr.bf16.mxu0 %v105_v3  ;;  %v1323_v3 = vld [vmem:[#allocation5 + $0x60] sm:$0xff]  }
  0x49   :  { %583 = vmatmul.mubr.bf16.vlgmr.msra.gmra.mrb[0].mxu1 %v102_v49  ;;  %1181 = vmatprep.subr.bf16.mxu0 %v1275_v50 }
  0x4a   :  { %1227 = vmatprep.mubr.msk.bf16.mxu1 %vm1419_vm0, %v1418_v45  ;;  %1226 = vmatpush3.bf16.msra.mxu1 %v1289_v58 }
  0x4b   :  { %786 = vmatprep.subr.bf16.mxu1 %v1293_v11  ;;  %v698_v11 = vsub.s32 0, %v1486_v29 }
  0x4c   :  { %1182 = vmatpush3.bf16.msra.mxu0 %v1276_v52 }
  0x4d   :  { %1183 = vmatprep.subr.bf16.mxu0 %v1277_v53 }
  0x50   :  { %1184 = vmatpush3.bf16.msra.mxu0 %v1278_v54 }
  0x51   :  { %1185 = vmatprep.subr.bf16.mxu0 %v1279_v55  ;;  %1228 = vmatmul.mubr.msk.bf16.vlgmr.msra.gmra.mrb[4].mxu1 %vm506_vm1, %v106_v4  ;;  %v1324_v4 = vld [vmem:[#allocation5 + $0x20] sm:$0xff]  }
  0x52   :  { %787 = vmatpush1.bf16.msra.mxu1 %v1291_v10  ;;  %818 = vmatprep.mubr.bf16.mxu1 %v1420_v26  ;;  %v1330_v10 = vld [vmem:[#allocation5 + $0x38] sm:$0xff]  }
  0x53   :  { %788 = vmatprep.subr.bf16.mxu1 %v1296_v12  ;;  %v694_v12 = vld [vmem:[%s1570_s4] sm:$0x3] }
  0x54   :  { %1186 = vmatpush3.bf16.msra.mxu0 %v1280_v56 }
  0x55   :  { %1187 = vmatprep.subr.bf16.mxu0 %v1281_v57 }
  0x56   :  { %789 = vmatpush1.bf16.msra.mxu1 %v1294_v13  ;;  %v702_v13 = vsub.s32 1, %v1486_v29 }
  0x57   :  { %790 = vmatprep.subr.bf16.mxu1 %v1299_v14  ;;  %v699_v14 = vrot.slane %v694_v12, %v698_v11 }
  0x58   :  { %1188 = vmatpush3.bf16.msra.mxu0 %v1282_v60 }
  0x59   :  { %1189 = vmatprep.subr.bf16.mxu0 %v1283_v63  ;;  %v1319_v63 = vld [vmem:[#allocation5 + $0x50] sm:$0xff]  }
  0x5a   :  { %791 = vmatpush1.bf16.msra.mxu1 %v1297_v15  ;;  %v703_v15 = vrot.slane %v694_v12, %v702_v13 }
  0x5b   :  { %792 = vmatprep.subr.bf16.mxu1 %v1302_v16 }
  0x5c   :  { %1190 = vmatpush3.bf16.msra.mxu0 %v1284_v2  ;;  %v1322_v2 = vld [vmem:[#allocation5 + $0x18] sm:$0xff]  }
  0x5d   :  { %1191 = vmatprep.subr.bf16.mxu0 %v1285_v5  ;;  %v1325_v5 = vld [vmem:[#allocation5 + $0x68] sm:$0xff]  }
  0x5e   :  { %793 = vmatpush1.bf16.msra.mxu1 %v1300_v17 }
  0x5f   :  { %794 = vmatprep.subr.bf16.mxu1 %v1305_v18 }
  0x60   :  { %1192 = vmatpush3.bf16.msra.mxu0 %v1286_v6  ;;  %v1326_v6 = vld [vmem:[#allocation5 + $0x28] sm:$0xff]  }
  0x61   :  { %1193 = vmatprep.subr.bf16.mxu0 %v1287_v7  ;;  %v1327_v7 = vld [vmem:[#allocation5 + $0x70] sm:$0xff]  }
  0x62   :  { %795 = vmatpush1.bf16.msra.mxu1 %v1303_v19 }
  0x63   :  { %796 = vmatprep.subr.bf16.mxu1 %v1308_v20 }
  0x64   :  { %1194 = vmatpush3.bf16.msra.mxu0 %v1288_v8  ;;  %v1328_v8 = vld [vmem:[#allocation5 + $0x30] sm:$0xff]  }
  0x65   :  { %1203 = vmatprep.subr.bf16.mxu0 %v1315_v27 }
  0x66   :  { %797 = vmatpush1.bf16.msra.mxu1 %v1306_v21 }
  0x67   :  { %623 = vmatmul.mubr.bf16.vlgmr.msra.gmra.mrb[4].mxu0 %v104_v9  ;;  %798 = vmatprep.subr.bf16.mxu1 %v1311_v22  ;;  %v1329_v9 = vld [vmem:[#allocation5 + $0x78] sm:$0xff]  }
  0x68   :  { %1204 = vmatpush3.bf16.msra.mxu0 %v1316_v28 }
  0x69   :  { %1205 = vmatprep.subr.bf16.mxu0 %v1317_v30 }
  0x6a   :  { %799 = vmatpush1.bf16.msra.mxu1 %v1309_v23 }
  0x6b   :  { %800 = vmatprep.subr.bf16.mxu1 %v1314_v24 }
  0x6c   :  { %1206 = vmatpush3.bf16.msra.mxu0 %v1318_v62 }
  0x6d   :  { %1207 = vmatprep.subr.bf16.mxu0 %v1319_v63 }
  0x6e   :  { %801 = vmatpush1.bf16.msra.mxu1 %v1312_v25 }
  0x70   :  { %1208 = vmatpush3.bf16.msra.mxu0 %v1320_v0 }
  0x71   :  { %1209 = vmatprep.subr.bf16.mxu0 %v1321_v1 }
  0x74   :  { %1210 = vmatpush3.bf16.msra.mxu0 %v1322_v2 }
  0x75   :  { %1211 = vmatprep.subr.bf16.mxu0 %v1323_v3 }
  0x78   :  { %1212 = vmatpush3.bf16.msra.mxu0 %v1324_v4 }
  0x79   :  { %1213 = vmatprep.subr.bf16.mxu0 %v1325_v5 }
  0x7c   :  { %1214 = vmatpush3.bf16.msra.mxu0 %v1326_v6 }
  0x7d   :  { %1215 = vmatprep.subr.bf16.mxu0 %v1327_v7 }
  0x80   :  { %1216 = vmatpush3.bf16.msra.mxu0 %v1328_v8 }
  0x81   :  { %1217 = vmatprep.subr.bf16.mxu0 %v1329_v9 }
  0x84   :  { %1218 = vmatpush3.bf16.msra.mxu0 %v1330_v10 }
 0x11a   :  { %v1151_v31 = vpop.f32.mrb[0].mxu0 }
 0x11b   :  { %v1152_v33 = vpop.f32.mrb[1].mxu0 }
 0x11c   :  { %v1153_v34 = vadd.f32 %v1152_v33, %v1151_v31  ;;  %v1154_v35 = vpop.f32.mrb[2].mxu0  ;;  %v1173_v36 = vpop.f32.mrb[0].mxu1 }
 0x11d   :  { %v1155_v37 = vpop.f32.mrb[3].mxu0  ;;  %v1174_v38 = vpop.f32.mrb[1].mxu1 }
 0x11e   :  { %v545_v39 = vadd.f32 %v1153_v34, %v1048_v32  ;;  %v1175_v40 = vadd.f32 %v1174_v38, %v1173_v36  ;;  %v1176_v41 = vpop.f32.mrb[2].mxu1  ;;  %v1118_v38 = vld [vmem:[%s1572_s6] ss:$0 sm:$0xff]  ;;  %s1385_s6 = scalar_lea.vmem %s1039_s15, 32 }
 0x11f   :  { %v1177_v42 = vpop.f32.mrb[3].mxu1  ;;  %p1386_p2 = scmp.ne.s32.totalorder %s1039_s15, %s1385_s6  ;;  %p1391_p4 = scmp.lt.s32.totalorder %s1385_s6, %s1385_s6 }
 0x120   :  { %v585_v43 = vadd.f32 %v1175_v40, %v545_v39 }
 0x121   :  { %p1392_p5 = por %p1391_p4, %p1390_p3 }
 0x123   :  { %p1393_p6 = pnand %p1392_p5, %p1386_p2 }
 0x124   :  { %v664_v44 = vpop.f32.mrb[4].mxu1 }
 0x125   :  { %v1229_v45 = vpop.f32.mrb[5].mxu1 }
 0x126   :  { %v667_v46 = vpop.f32.mrb[6].mxu1 }
 0x127   :  { %v1230_v47 = vpop.f32.mrb[7].mxu1 }
 0x13a   :  { %v1195_v48 = vpop.f32.mrb[4].mxu0 }
 0x13b   :  { %v1196_v49 = vpop.f32.mrb[5].mxu0 }
 0x13c   :  { %v1197_v50 = vadd.f32 %v1196_v49, %v1195_v48  ;;  %v1198_v51 = vpop.f32.mrb[6].mxu0 }
 0x13d   :  { %v1199_v52 = vpop.f32.mrb[7].mxu0 }
 0x13e   :  { %v625_v53 = vadd.f32 %v1197_v50, %v585_v43 }
 0x140   :  { %v665_v54 = vadd.f32 %v664_v44, %v625_v53 }
 0x142   :  { %v671_v55 = vmul.f32 1.442695, %v665_v54  ;;  %vm670_vm2 = vcmp.gt.f32.partialorder %v665_v54, 0.0 }
 0x144   :  { %1331 = vpow2.f32 %v671_v55 }
 0x14e   :  { %v1332_v56 = vpop.eup %1331 }
 0x14f   :  { %v1099_v57 = vadd.f32 -1.0, %v1332_v56 }
 0x151   :  { %v674_v58 = vmul.f32 1.6732632, %v1099_v57 }
 0x153   :  { %v675_v59 = vsel %vm670_vm2, %v665_v54, %v674_v58 }
 0x154   :  { %v676_v60 = vmul.f32 1.050701, %v675_v59 }
 0x156   :  { %v677_v61 = vpack.c.bf16 %v676_v60, %v676_v60 }
 0x158   :  { %819 = vmatmul.mubr.bf16.vlgmr.msra.gmra.mrb[8].mxu1 %v677_v61 }
 0x22b   :  { %v820_v16 = vpop.f32.mrb[8].mxu1 }
 0x22c   :  { %v821_v17 = vadd.f32 %v820_v16, %v699_v14  ;;  %v822_v18 = vpop.f32.mrb[9].mxu1 }
 0x22d   :  { %v823_v19 = vadd.f32 %v822_v18, %v703_v15  ;;  %v824_v20 = vpop.f32.mrb[10].mxu1 }
 0x22e   :  { %v829_v21 = vmul.f32 1.442695, %v821_v17  ;;  %v825_v22 = vpop.f32.mrb[11].mxu1  ;;  %vm827_vm3 = vcmp.gt.f32.partialorder %v821_v17, 0.0 }
 0x22f   :  { %v831_v23 = vmul.f32 1.442695, %v823_v19  ;;  %vm828_vm4 = vcmp.gt.f32.partialorder %v823_v19, 0.0 }
 0x230   :  { %1333 = vpow2.f32 %v829_v21 }
 0x231   :  { %1335 = vpow2.f32 %v831_v23 }
 0x23a   :  { %v1334_v24 = vpop.eup %1333 }
 0x23b   :  { %v1336_v25 = vpop.eup %1335  ;;  %v1116_v26 = vadd.f32 -1.0, %v1334_v24 }
 0x23c   :  { %v1117_v27 = vadd.f32 -1.0, %v1336_v25 }
 0x23d   :  { %v835_v28 = vmul.f32 1.6732632, %v1116_v26 }
 0x23e   :  { %v836_v30 = vmul.f32 1.6732632, %v1117_v27 }
 0x23f   :  { %v837_v29 = vsel %vm827_vm3, %v821_v17, %v835_v28 }
 0x240   :  { %v839_v31 = vmul.f32 1.050701, %v837_v29  ;;  %v838_v32 = vsel %vm828_vm4, %v823_v19, %v836_v30 }
 0x241   :  { %v840_v33 = vmul.f32 1.050701, %v838_v32 }
 0x242   :  { %v841_v35 = vpack.c.bf16 %v839_v31, %v839_v31 }
 0x243   :  { %v842_v34 = vpack.c.bf16 %v840_v33, %v840_v33 }
 0x245   :  { %1010 = vmatprep.mubr.bf16.mxu0 %v842_v34 }
 0x246   :  { %1011 = vmatmul.mubr.bf16.vlgmr.msra.gmra.mrb[8].mxu0 %v841_v35 }
 0x319   :  { %v1219_v36 = vpop.f32.mrb[8].mxu0 }
 0x31a   :  { %v1220_v37 = vpop.f32.mrb[9].mxu0 }
 0x31b   :  { %v1221_v39 = vadd.f32 %v1220_v37, %v1219_v36  ;;  %v1222_v40 = vpop.f32.mrb[10].mxu0 }
 0x31c   :  { %v1223_v41 = vpop.f32.mrb[11].mxu0 }
 0x31d   :  { %v1013_v42 = vadd.f32 %v1221_v39, %v1118_v38 }
 0x31f   :  { %v1019_v43 = vsel %vm1018_vm5, %v1013_v42, -inf }
 0x320   :  { %1020 = vmax.xlane.f32.xlu0 %v1019_v43 }
 0x3ad   :  { %v1021_v44 = vpop.xlane.xlu0 %1020 }
 0x3ae   :  { %v1022_v45 = vsub.f32 %v1013_v42, %v1021_v44 }
 0x3b0   :  { %v1023_v46 = vmul.f32 1.442695, %v1022_v45 }
 0x3b2   :  { %1337 = vpow2.f32 %v1023_v46 }
 0x3bc   :  { %v1338_v47 = vpop.eup %1337 }
 0x3bd   :  { %v1025_v48 = vsel %vm1018_vm5, %v1338_v47, 0.0 }
 0x3be   :  { %1026 = vadd.xlane.f32.xlu0 %v1025_v48 }
 0x44b   :  { %v1027_v49 = vpop.xlane.xlu0 %1026 }
 0x44c   :  { %1339 = vlog2.f32 %v1027_v49 }
 0x456   :  { %v1340_v50 = vpop.eup %1339 }
 0x457   :  { %v1029_v51 = vmul.f32 0.6931472, %v1340_v50 }
 0x459   :  { %v1030_v52 = vsub.f32 %v1022_v45, %v1029_v51 }
 0x45b   :  { %1031 = vst [vmem:[#allocation7] sm:$0x3] %v1030_v52 }
 0x45c   :  { %1396 = shalt.err (!%p1393_p6)
}
 0x45d   :  { %s1397_s18 = scalar_lea.hbm %s1573_s7, 32 }
 0x45e   :  { %p1398_p7 = scmp.ne.s32.totalorder %s1573_s7, %s1397_s18  ;;  %p1401_p8 = scmp.lt.u32.totalorder %s1397_s18, %s1573_s7 }
 0x460   :  { %p1403_p9 = pnand %p1401_p8, %p1398_p7 }
 0x462   :  { %1406 = shalt.err (!%p1403_p9)
}
 0x463   :  { %1041 = dma.vmem_to_hbm [thread:$0]  %s1039_s15, 32, %s1573_s7, [#allocation4]  }
 0x464   :  { %1411 = dma.done.wait [#allocation4], 32  }
 0x465   :  { %1412 = vsyncadd [#allocation4], 4294967264 }
 0x466   :  { %1045 = vsyncpa [#allocation3], 1 }
 0x467   :  { %1046 = vsyncpa [#allocation6], 1 }
 0x468   :  { %1047 = vsyncpa [#allocation4], 1 }

</bundles_post_ra>
